<compile_context>
chip_gen: v7x
topology: tpu7x:2x2x1
jax: 0.10.0
libtpu: 0.0.40
codegen_flags: <defaults>
</compile_context>

<pallas_src>
import jax
import jax.numpy as jnp
from jax.experimental import pallas as pl
from jax.experimental.pallas import tpu as pltpu

_MiB = 1024 * 1024


def _round_up(x, m):
    return ((x + m - 1) // m) * m


def _vmem_capacity_bytes():
    """Physical VMEM per TensorCore; conservative fallback if the query fails."""
    try:
        return int(pltpu.get_tpu_info().vmem_capacity_bytes)
    except Exception:
        return 64 * _MiB  # v7x per-TC size — safe lower bound for v5e/v6e too


def _linear_bias_kernel(x_ref, wt_ref, b_ref, o_ref):
    """out_tile = x_tile[m,k] @ wt_tile[k,n] + bias_tile[1,n]  (f32 MXU accumulate)."""
    acc = jnp.dot(x_ref[...], wt_ref[...], preferred_element_type=jnp.float32)
    o_ref[...] = (acc + b_ref[...].astype(jnp.float32)).astype(o_ref.dtype)


def prepare_weight(weight):
    """One-time (init) conversion of the PyTorch-layout weight [N, K] to the
    MXU-friendly [K, N] layout.  Call once and cache; NOT per forward call."""
    return jnp.asarray(weight).T


def softmax_head_forward(x, weight_t, bias, *, tm=512, tn=1024,
                         single_block_bytes=None, vmem_limit_bytes=None,
                         force_tiled=False):
    """out = x @ weight_t + bias  ==  F.linear(x, weight, bias) with weight_t = weight.T.

    x:        [B, K]
    weight_t: [K, N]   (pre-transposed once via prepare_weight)
    bias:     [N]
    """
    B, K = x.shape
    K2, N = weight_t.shape
    assert K == K2, (K, K2)
    x_it = jnp.dtype(x.dtype).itemsize
    w_it = jnp.dtype(weight_t.dtype).itemsize
    o_it = x_it
    b_it = jnp.dtype(bias.dtype).itemsize
    bias2d = bias.reshape(1, N)

    # Per-generation VMEM sizing: scoped limit and working-set budget derived from
    # the chip's physical VMEM (v5e/v6e: 128 MiB -> 64 MiB limit; v7x: 64 MiB -> ~44 MiB).
    vmem_cap = _vmem_capacity_bytes()
    if vmem_limit_bytes is None:
        vmem_limit_bytes = min(int(vmem_cap * 0.7), 64 * _MiB)
    ws_budget = int(vmem_limit_bytes * 0.75)          # double-buffered tile working set
    if single_block_bytes is None:
        single_block_bytes = int(vmem_limit_bytes * 0.4)

    # ---------------- Grid-free single-block fast path ----------------
    # x + W + bias + out + f32 accumulator all resident: one DMA per operand,
    # one MXU pass, zero grid/pipeline overhead.
    total_bytes = (B * K * x_it + K * N * w_it + N * b_it
                   + B * N * o_it + B * N * 4)
    if total_bytes <= single_block_bytes and not force_tiled:
        return pl.pallas_call(
            _linear_bias_kernel,
            out_shape=jax.ShapeDtypeStruct((B, N), x.dtype),
            in_specs=[
                pl.BlockSpec(memory_space=pltpu.MemorySpace.VMEM),   # x   [B, K]
                pl.BlockSpec(memory_space=pltpu.MemorySpace.VMEM),   # Wt  [K, N]
                pl.BlockSpec(memory_space=pltpu.MemorySpace.VMEM),   # b   [1, N]
            ],
            out_specs=pl.BlockSpec(memory_space=pltpu.MemorySpace.VMEM),
            compiler_params=pltpu.CompilerParams(
                vmem_limit_bytes=vmem_limit_bytes),
        )(x, weight_t, bias2d)

    # ---------------- Tiled path (large B and/or N) ----------------
    # K stays whole (no reduction axis, no accumulator scratch, no init/finalize).
    tm = min(_round_up(B, 8), _round_up(tm, 8))
    tn = min(_round_up(N, 128), _round_up(tn, 128))

    def working_set(tm_, tn_):
        # double-buffered x tile + W tile + out tile (bias negligible)
        return 2 * (tm_ * K * x_it + K * tn_ * w_it + tm_ * tn_ * o_it)

    while working_set(tm, tn) > ws_budget and tn > 128:
        tn = _round_up(max(128, tn // 2), 128)
    while working_set(tm, tn) > ws_budget and tm > 8:
        tm = _round_up(max(8, tm // 2), 8)
    # TODO(synk): if K alone ever outgrows VMEM, reintroduce a K-reduction grid axis
    #             with an f32 accumulator scratch.

    n_i = pl.cdiv(B, tm)   # row-of-x tiles
    n_j = pl.cdiv(N, tn)   # column-of-W / output tiles

    # Choose which operand stays resident: the operand bound to the INNER grid axis
    # is re-DMA'd once per outer step, so bind the cheaper-to-re-read one there.
    re_read_w = (n_i - 1) * K * N * w_it   # cost of x-outer ordering
    re_read_x = (n_j - 1) * B * K * x_it   # cost of weight-outer ordering

    if re_read_x <= re_read_w:
        # Weight-resident: N axis outermost -> each weight tile fetched exactly once.
        grid = (n_j, n_i)
        x_spec = pl.BlockSpec((tm, K), lambda j, i: (i, 0))
        w_spec = pl.BlockSpec((K, tn), lambda j, i: (0, j))
        b_spec = pl.BlockSpec((1, tn), lambda j, i: (0, j))
        o_spec = pl.BlockSpec((tm, tn), lambda j, i: (i, j))
    else:
        # Activation-resident: B axis outermost -> each x tile fetched exactly once.
        grid = (n_i, n_j)
        x_spec = pl.BlockSpec((tm, K), lambda i, j: (i, 0))
        w_spec = pl.BlockSpec((K, tn), lambda i, j: (0, j))
        b_spec = pl.BlockSpec((1, tn), lambda i, j: (0, j))
        o_spec = pl.BlockSpec((tm, tn), lambda i, j: (i, j))

    # cdiv grid + out_shape (B, N): ragged edges handled by masked reads/writes,
    # no wrapper-side pad of the weight and no output slice.
    return pl.pallas_call(
        _linear_bias_kernel,
        out_shape=jax.ShapeDtypeStruct((B, N), x.dtype),
        grid=grid,
        in_specs=[x_spec, w_spec, b_spec],
        out_specs=o_spec,
        compiler_params=pltpu.CompilerParams(
            dimension_semantics=("parallel", "parallel"),
            vmem_limit_bytes=vmem_limit_bytes,
        ),
    )(x, weight_t, bias2d)


def init_params(key, in_features, out_features):
    # xavier_uniform_ on weight [out_features, in_features]; zeros on bias.
    bound = (6.0 / (in_features + out_features)) ** 0.5
    weight = jax.random.uniform(
        key, (out_features, in_features), jnp.float32, minval=-bound, maxval=bound
    )
    bias = jnp.zeros((out_features,), jnp.float32)
    return weight, bias


if __name__ == "__main__":
    key = jax.random.PRNGKey(0)
    k_w, k_x, k_w2, k_w3 = jax.random.split(key, 4)

    # --- small shape: grid-free single-block path ---
    in_features, out_features, batch = 256, 384, 16
    weight, bias = init_params(k_w, in_features, out_features)
    weight_t = prepare_weight(weight)          # one-time layout prep (cached)
    x = jax.random.normal(k_x, (batch, in_features), jnp.float32)
    # `label` in the PyTorch forward is unused by the computation; ignored here.

    ref = x @ weight.T + bias
    out = jax.block_until_ready(softmax_head_forward(x, weight_t, bias))
    assert out.shape == (batch, out_features)
    assert jnp.allclose(out, ref, atol=1e-4, rtol=1e-4)

    # --- tiled path, ragged class count (1000), weight-resident grid ordering ---
    out_features2 = 1000
    weight2, bias2 = init_params(k_w2, in_features, out_features2)
    bias2 = bias2 + 0.5  # nonzero bias so the check is meaningful
    weight2_t = prepare_weight(weight2)
    ref2 = x @ weight2.T + bias2
    out2 = jax.block_until_ready(
        softmax_head_forward(x, weight2_t, bias2, force_tiled=True, tm=8, tn=128)
    )
    assert out2.shape == (batch, out_features2)
    assert jnp.allclose(out2, ref2, atol=1e-4, rtol=1e-4)

    # --- tiled path, large batch / small N: activation-resident grid ordering ---
    batch3, in3, out3 = 512, 64, 256
    weight3, bias3 = init_params(k_w3, in3, out3)
    weight3_t = prepare_weight(weight3)
    x3 = jax.random.normal(jax.random.fold_in(k_x, 3), (batch3, in3), jnp.float32)
    ref3 = x3 @ weight3.T + bias3
    out3_arr = jax.block_until_ready(
        softmax_head_forward(x3, weight3_t, bias3, force_tiled=True, tm=256, tn=128)
    )
    assert out3_arr.shape == (batch3, out3)
    assert jnp.allclose(out3_arr, ref3, atol=1e-4, rtol=1e-4)

    print("KERNEL_OK")
</pallas_src>

<mosaic_0001>
module attributes {stable_mosaic.version = 11 : i64} {
  func.func @_linear_bias_kernel(%arg0: memref<16x256xf32, #tpu.memory_space<vmem>>, %arg1: memref<256x384xf32, #tpu.memory_space<vmem>>, %arg2: memref<1x384xf32, #tpu.memory_space<vmem>>, %arg3: memref<16x384xf32, #tpu.memory_space<vmem>>) attributes {dimension_semantics = [], scalar_prefetch = 0 : i64, scratch_operands = 0 : i64, tpu.core_type = #tpu.core_type<tc>} {
    %c0 = arith.constant 0 : index
    %c0_0 = arith.constant 0 : index
    %0 = vector.load %arg0[%c0, %c0_0] : memref<16x256xf32, #tpu.memory_space<vmem>>, vector<16x256xf32>
    %c0_1 = arith.constant 0 : index
    %c0_2 = arith.constant 0 : index
    %1 = vector.load %arg1[%c0_1, %c0_2] : memref<256x384xf32, #tpu.memory_space<vmem>>, vector<256x384xf32>
    %cst = arith.constant dense<0.000000e+00> : vector<16x384xf32>
    %2 = tpu.matmul %0, %1, %cst {dimension_numbers = #tpu.dot_dimension_numbers<[1], [0], [0], [1], [0, 0, 1, 1], [], []>} : vector<16x256xf32>, vector<256x384xf32>, vector<16x384xf32> -> vector<16x384xf32>
    %c0_3 = arith.constant 0 : index
    %c0_4 = arith.constant 0 : index
    %3 = vector.load %arg2[%c0_3, %c0_4] : memref<1x384xf32, #tpu.memory_space<vmem>>, vector<1x384xf32>
    %4 = vector.broadcast %3 : vector<1x384xf32> to vector<16x384xf32>
    %5 = arith.addf %2, %4 : vector<16x384xf32>
    %c0_5 = arith.constant 0 : index
    %c0_6 = arith.constant 0 : index
    %6 = vector.load %arg3[%c0_5, %c0_6] : memref<16x384xf32, #tpu.memory_space<vmem>>, vector<16x384xf32>
    tpu.vector_store %arg3[%c0_5, %c0_6], %5 {strides = array<i32>} : memref<16x384xf32, #tpu.memory_space<vmem>>, vector<16x384xf32>,
    return
  }
}

</mosaic_0001>

<bundles_post_ra>
// kernel: tpu_custom_call.1
= control target key start
LH: loop header
LB: loop body
LE: loop exit
PB: predicated region body
PF: predicated region fallthrough
CT: control target
= control target key end

     0   :  { %8 = vsyncpa [#allocation3], 0  ;;  %s621_s0 = inlined_call_operand.hbm [shape: f32[16,256], index: 0, kind: input, shape index: {}]   ;;  %s622_s1 = inlined_call_operand.hbm [shape: f32[256,384], index: 1, kind: input, shape index: {}]   ;;  %s623_s2 = inlined_call_operand.vmem [shape: f32[1,384], index: 2, kind: input, shape index: {}]   ;;  %s624_s3 = inlined_call_operand.hbm [shape: f32[16,384], index: 3, kind: output, shape index: {}]  }
   0x1   :  { %9 = vsyncpa [#allocation6], 0 }
   0x2   :  { %10 = vsyncpa [#allocation4], 0  ;;  %s549_s12 = smov [#allocation2]   ;;  %s477_s16 = scalar_lea.hbm %s621_s0, 512 }
   0x3   :  { %s16_s13 = sshll.u32 %s549_s12, 4  ;;  %p478_p0 = scmp.ne.s32.totalorder %s621_s0, %s477_s16  ;;  %s17_s13 = int_to_ptr.vmem [resolvable:$true] %s16_s13 }
   0x4   :  { %p481_p1 = scmp.lt.u32.totalorder %s477_s16, %s621_s0 }
   0x6   :  { %p483_p2 = pnand %p481_p1, %p478_p0 }
   0x8   :  { %486 = shalt.err (!%p483_p2)
}
   0x9   :  { %s487_s21 = scalar_lea.vmem %s17_s13, 512  ;;  %p492_p4 = scmp.lt.s32.totalorder %s17_s13, %s17_s13 }
   0xa   :  { %p488_p3 = scmp.ne.s32.totalorder %s17_s13, %s487_s21  ;;  %p493_p5 = scmp.lt.s32.totalorder %s487_s21, %s487_s21 }
   0xc   :  { %p494_p6 = por %p493_p5, %p492_p4 }
   0xe   :  { %p495_p7 = pnand %p494_p6, %p488_p3 }
  0x10   :  { %498 = shalt.err (!%p495_p7)
}
  0x11   :  { %s550_s22 = smov 256   ;;  %s551_s23 = smov 16  }
  0x12   :  { %22 = dma.hbm_to_vmem [thread:$0]  %s621_s0, 512, %s17_s13, [#allocation3], %s550_s22, %s550_s22, %s551_s23  }
  0x13   :  { %s552_s26 = smov [#allocation5]   ;;  %s499_s30 = scalar_lea.hbm %s622_s1, 12288 }
  0x14   :  { %s28_s27 = sshll.u32 %s552_s26, 4  ;;  %p500_p8 = scmp.ne.s32.totalorder %s622_s1, %s499_s30  ;;  %s29_s27 = int_to_ptr.vmem [resolvable:$true] %s28_s27 }
  0x15   :  { %p503_p9 = scmp.lt.u32.totalorder %s499_s30, %s622_s1 }
  0x17   :  { %p505_p10 = pnand %p503_p9, %p500_p8 }
  0x19   :  { %508 = shalt.err (!%p505_p10)
}
  0x1a   :  { %s509_s8 = scalar_lea.vmem %s29_s27, 12288  ;;  %p514_p12 = scmp.lt.s32.totalorder %s29_s27, %s29_s27 }
  0x1b   :  { %p510_p11 = scmp.ne.s32.totalorder %s29_s27, %s509_s8  ;;  %p515_p13 = scmp.lt.s32.totalorder %s509_s8, %s509_s8 }
  0x1d   :  { %p516_p0 = por %p515_p13, %p514_p12 }
  0x1f   :  { %p517_p1 = pnand %p516_p0, %p510_p11 }
  0x21   :  { %520 = shalt.err (!%p517_p1)
}
  0x22   :  { %s553_s0 = smov 384   ;;  %s554_s9 = smov 24  }
  0x23   :  { %34 = dma.hbm_to_vmem [thread:$0]  %s622_s1, 12288, %s29_s27, [#allocation6], %s553_s0, %s553_s0, %s554_s9  }
  0x24   :  { %543 = dma.done.wait [#allocation3], 512  }
  0x25   :  { %544 = vsyncadd [#allocation3], 4294966784 }
  0x26   :  { %545 = dma.done.wait [#allocation6], 12288  }
  0x27   :  { %546 = vsyncadd [#allocation6], 4294955008  ;;  %v48_v0 = vld [vmem:[#allocation5 + $0x8] sm:$0xff]  ;;  %v51_v1 = vld [vmem:[#allocation5 + $0x20] sm:$0xff] }
  0x28   :  { %v47_v2 = vld [vmem:[#allocation5] sm:$0xff]  ;;  %v374_v3 = vpack.c.bf16 %v51_v1, %v48_v0  ;;  %v50_v4 = vld [vmem:[#allocation5 + $0x18] sm:$0xff]  ;;  %v57_v6 = vld [vmem:[#allocation5 + $0x50] sm:$0xff] }
  0x29   :  { %v54_v5 = vld [vmem:[#allocation5 + $0x38] sm:$0xff]  ;;  %v376_v7 = vpack.c.bf16 %v50_v4, %v47_v2  ;;  %v53_v9 = vld [vmem:[#allocation5 + $0x30] sm:$0xff]  ;;  %v56_v10 = vld [vmem:[#allocation5 + $0x48] sm:$0xff] }
  0x2a   :  { %v378_v8 = vpack.c.bf16 %v57_v6, %v54_v5  ;;  %v60_v11 = vld [vmem:[#allocation5 + $0x68] sm:$0xff]  ;;  %375 = vmatprep.subr.bf16.mxu0 %v374_v3  ;;  %v63_v12 = vld [vmem:[#allocation5 + $0x80] sm:$0xff]  ;;  %v380_v13 = vpack.c.bf16 %v56_v10, %v53_v9  ;;  %v62_v16 = vld [vmem:[#allocation5 + $0x78] sm:$0xff] }
  0x2b   :  { %377 = vmatpush1.bf16.msra.mxu0 %v376_v7  ;;  %v382_v14 = vpack.c.bf16 %v63_v12, %v60_v11  ;;  %v59_v15 = vld [vmem:[#allocation5 + $0x60] sm:$0xff]  ;;  %v66_v17 = vld [vmem:[#allocation5 + $0x98] sm:$0xff]  ;;  %v69_v18 = vld [vmem:[#allocation5 + $0xb0] sm:$0xff] }
  0x2c   :  { %379 = vmatprep.subr.bf16.mxu0 %v378_v8  ;;  %v384_v19 = vpack.c.bf16 %v62_v16, %v59_v15  ;;  %v386_v20 = vpack.c.bf16 %v69_v18, %v66_v17  ;;  %v65_v21 = vld [vmem:[#allocation5 + $0x90] sm:$0xff]  ;;  %v68_v22 = vld [vmem:[#allocation5 + $0xa8] sm:$0xff]  ;;  %v75_v24 = vld [vmem:[#allocation5 + $0xe0] sm:$0xff] }
  0x2d   :  { %v72_v23 = vld [vmem:[#allocation5 + $0xc8] sm:$0xff]  ;;  %v97_v25 = vld [vmem:[#allocation5 + $0x190] sm:$0xff]  ;;  %v388_v29 = vpack.c.bf16 %v68_v22, %v65_v21  ;;  %v71_v30 = vld [vmem:[#allocation5 + $0xc0] sm:$0xff] }
  0x2e   :  { %v100_v26 = vld [vmem:[#allocation5 + $0x1a8] sm:$0xff]  ;;  %v49_v27 = vld [vmem:[#allocation5 + $0x10] sm:$0xff]  ;;  %v74_v31 = vld [vmem:[#allocation5 + $0xd8] sm:$0xff]  ;;  %v390_v34 = vpack.c.bf16 %v75_v24, %v72_v23 }
  0x2f   :  { %381 = vmatpush1.bf16.msra.mxu0 %v380_v13  ;;  %v52_v28 = vld [vmem:[#allocation5 + $0x28] sm:$0xff]  ;;  %v438_v32 = vpack.c.bf16 %v100_v26, %v97_v25  ;;  %v78_v35 = vld [vmem:[#allocation5 + $0xf8] sm:$0xff]  ;;  %v103_v36 = vld [vmem:[#allocation5 + $0x1c0] sm:$0xff]  ;;  %v392_v43 = vpack.c.bf16 %v74_v31, %v71_v30 }
  0x30   :  { %383 = vmatprep.subr.bf16.mxu0 %v382_v14  ;;  %v440_v33 = vpack.c.bf16 %v52_v28, %v49_v27  ;;  %v106_v37 = vld [vmem:[#allocation5 + $0x1d8] sm:$0xff]  ;;  %v81_v38 = vld [vmem:[#allocation5 + $0x110] sm:$0xff]  ;;  %v55_v40 = vld [vmem:[#allocation5 + $0x40] sm:$0xff] }
  0x31   :  { %439 = vmatprep.subr.bf16.mxu1 %v438_v32  ;;  %v442_v39 = vpack.c.bf16 %v106_v37, %v103_v36  ;;  %v58_v41 = vld [vmem:[#allocation5 + $0x58] sm:$0xff]  ;;  %v109_v44 = vld [vmem:[#allocation5 + $0x1f0] sm:$0xff]  ;;  %v112_v45 = vld [vmem:[#allocation5 + $0x208] sm:$0xff]  ;;  %v394_v47 = vpack.c.bf16 %v81_v38, %v78_v35 }
  0x32   :  { %441 = vmatpush3.bf16.msra.mxu1 %v440_v33  ;;  %v444_v42 = vpack.c.bf16 %v58_v41, %v55_v40  ;;  %v61_v46 = vld [vmem:[#allocation5 + $0x70] sm:$0xff]  ;;  %v80_v49 = vld [vmem:[#allocation5 + $0x108] sm:$0xff]  ;;  %v446_v50 = vpack.c.bf16 %v112_v45, %v109_v44  ;;  %v87_v53 = vld [vmem:[#allocation5 + $0x140] sm:$0xff] }
  0x33   :  { %385 = vmatpush1.bf16.msra.mxu0 %v384_v19  ;;  %443 = vmatprep.subr.bf16.mxu1 %v442_v39  ;;  %v77_v48 = vld [vmem:[#allocation5 + $0xf0] sm:$0xff]  ;;  %v64_v51 = vld [vmem:[#allocation5 + $0x88] sm:$0xff]  ;;  %v115_v54 = vld [vmem:[#allocation5 + $0x220] sm:$0xff] }
  0x34   :  { %387 = vmatprep.subr.bf16.mxu0 %v386_v20  ;;  %v84_v52 = vld [vmem:[#allocation5 + $0x128] sm:$0xff]  ;;  %v448_v55 = vpack.c.bf16 %v64_v51, %v61_v46  ;;  %v118_v56 = vld [vmem:[#allocation5 + $0x238] sm:$0xff]  ;;  %v396_v57 = vpack.c.bf16 %v80_v49, %v77_v48  ;;  %v83_v58 = vld [vmem:[#allocation5 + $0x120] sm:$0xff] }
  0x35   :  { %v450_v59 = vpack.c.bf16 %v118_v56, %v115_v54  ;;  %v67_v60 = vld [vmem:[#allocation5 + $0xa0] sm:$0xff]  ;;  %v70_v61 = vld [vmem:[#allocation5 + $0xb8] sm:$0xff]  ;;  %v398_v62 = vpack.c.bf16 %v87_v53, %v84_v52  ;;  %v121_v0 = vld [vmem:[#allocation5 + $0x250] sm:$0xff] }
  0x36   :  { %445 = vmatpush3.bf16.msra.mxu1 %v444_v42  ;;  %v86_v63 = vld [vmem:[#allocation5 + $0x138] sm:$0xff]  ;;  %v124_v1 = vld [vmem:[#allocation5 + $0x268] sm:$0xff]  ;;  %v93_v3 = vld [vmem:[#allocation5 + $0x170] sm:$0xff]  ;;  %v452_v4 = vpack.c.bf16 %v70_v61, %v67_v60 }
  0x37   :  { %389 = vmatpush1.bf16.msra.mxu0 %v388_v29  ;;  %447 = vmatprep.subr.bf16.mxu1 %v446_v50  ;;  %v90_v2 = vld [vmem:[#allocation5 + $0x158] sm:$0xff]  ;;  %v400_v5 = vpack.c.bf16 %v86_v63, %v83_v58  ;;  %v89_v6 = vld [vmem:[#allocation5 + $0x150] sm:$0xff]  ;;  %v454_v7 = vpack.c.bf16 %v124_v1, %v121_v0  ;;  %v76_v9 = vld [vmem:[#allocation5 + $0xe8] sm:$0xff] }
  0x38   :  { %391 = vmatprep.subr.bf16.mxu0 %v390_v34  ;;  %v73_v8 = vld [vmem:[#allocation5 + $0xd0] sm:$0xff]  ;;  %v402_v10 = vpack.c.bf16 %v93_v3, %v90_v2  ;;  %v92_v11 = vld [vmem:[#allocation5 + $0x168] sm:$0xff]  ;;  %v127_v12 = vld [vmem:[#allocation5 + $0x280] sm:$0xff] }
  0x39   :  { %v130_v13 = vld [vmem:[#allocation5 + $0x298] sm:$0xff]  ;;  %v96_v14 = vld [vmem:[#allocation5 + $0x188] sm:$0xff]  ;;  %v99_v15 = vld [vmem:[#allocation5 + $0x1a0] sm:$0xff]  ;;  %v456_v16 = vpack.c.bf16 %v76_v9, %v73_v8  ;;  %v404_v17 = vpack.c.bf16 %v92_v11, %v89_v6 }
  0x3a   :  { %449 = vmatpush3.bf16.msra.mxu1 %v448_v55  ;;  %v95_v18 = vld [vmem:[#allocation5 + $0x180] sm:$0xff]  ;;  %v458_v19 = vpack.c.bf16 %v130_v13, %v127_v12  ;;  %v82_v21 = vld [vmem:[#allocation5 + $0x118] sm:$0xff]  ;;  %v406_v22 = vpack.c.bf16 %v99_v15, %v96_v14  ;;  %v133_v24 = vld [vmem:[#allocation5 + $0x2b0] sm:$0xff] }
  0x3b   :  { %393 = vmatpush1.bf16.msra.mxu0 %v392_v43  ;;  %451 = vmatprep.subr.bf16.mxu1 %v450_v59  ;;  %v79_v20 = vld [vmem:[#allocation5 + $0x100] sm:$0xff]  ;;  %v98_v23 = vld [vmem:[#allocation5 + $0x198] sm:$0xff]  ;;  %v136_v25 = vld [vmem:[#allocation5 + $0x2c8] sm:$0xff] }
  0x3c   :  { %395 = vmatprep.subr.bf16.mxu0 %v394_v47  ;;  %v102_v26 = vld [vmem:[#allocation5 + $0x1b8] sm:$0xff]  ;;  %v105_v27 = vld [vmem:[#allocation5 + $0x1d0] sm:$0xff]  ;;  %v460_v28 = vpack.c.bf16 %v82_v21, %v79_v20  ;;  %v44_v29 = vld [vmem:[#allocation2 + $0x8] sm:$0xff]  ;;  %v408_v30 = vpack.c.bf16 %v98_v23, %v95_v18  ;;  %v462_v32 = vpack.c.bf16 %v136_v25, %v133_v24  ;;  %v145_v20 = vlaneseq }
  0x3d   :  { %v101_v31 = vld [vmem:[#allocation5 + $0x1b0] sm:$0xff]  ;;  %v88_v34 = vld [vmem:[#allocation5 + $0x148] sm:$0xff]  ;;  %v410_v35 = vpack.c.bf16 %v105_v27, %v102_v26  ;;  %v139_v37 = vld [vmem:[#allocation5 + $0x2e0] sm:$0xff]  ;;  %301 = vmatprep.mubr.f32.mxu1 %v44_v29  ;;  %224 = vmatprep.mubr.f32.mxu0 %v44_v29 }
  0x3e   :  { %453 = vmatpush3.bf16.msra.mxu1 %v452_v4  ;;  %v85_v33 = vld [vmem:[#allocation5 + $0x130] sm:$0xff]  ;;  %v104_v36 = vld [vmem:[#allocation5 + $0x1c8] sm:$0xff]  ;;  %v142_v38 = vld [vmem:[#allocation5 + $0x2f8] sm:$0xff]  ;;  %v146_v21 = vshrl.u32 %v145_v20, 7 }
  0x3f   :  { %397 = vmatpush1.bf16.msra.mxu0 %v396_v57  ;;  %455 = vmatprep.subr.bf16.mxu1 %v454_v7  ;;  %v108_v39 = vld [vmem:[#allocation5 + $0x1e8] sm:$0xff]  ;;  %v111_v40 = vld [vmem:[#allocation5 + $0x200] sm:$0xff]  ;;  %v464_v41 = vpack.c.bf16 %v88_v34, %v85_v33  ;;  %v412_v42 = vpack.c.bf16 %v104_v36, %v101_v31  ;;  %v466_v43 = vpack.c.bf16 %v142_v38, %v139_v37  ;;  %v94_v45 = vld [vmem:[#allocation5 + $0x178] sm:$0xff] }
  0x40   :  { %399 = vmatprep.subr.bf16.mxu0 %v398_v62  ;;  %v91_v44 = vld [vmem:[#allocation5 + $0x160] sm:$0xff]  ;;  %v414_v46 = vpack.c.bf16 %v111_v40, %v108_v39  ;;  %v110_v48 = vld [vmem:[#allocation5 + $0x1f8] sm:$0xff]  ;;  %v117_v50 = vld [vmem:[#allocation5 + $0x230] sm:$0xff]  ;;  %v147_v33 = vsub.s32 0, %v146_v21  ;;  %v151_v34 = vsub.s32 1, %v146_v21 }
  0x41   :  { %v107_v47 = vld [vmem:[#allocation5 + $0x1e0] sm:$0xff]  ;;  %v114_v49 = vld [vmem:[#allocation5 + $0x218] sm:$0xff]  ;;  %v468_v51 = vpack.c.bf16 %v94_v45, %v91_v44  ;;  %v113_v54 = vld [vmem:[#allocation5 + $0x210] sm:$0xff] }
  0x42   :  { %457 = vmatpush3.bf16.msra.mxu1 %v456_v16  ;;  %v416_v52 = vpack.c.bf16 %v110_v48, %v107_v47  ;;  %v418_v53 = vpack.c.bf16 %v117_v50, %v114_v49  ;;  %v116_v55 = vld [vmem:[#allocation5 + $0x228] sm:$0xff]  ;;  %v123_v57 = vld [vmem:[#allocation5 + $0x260] sm:$0xff]  ;;  %v46_v60 = vld [vmem:[#allocation2 + $0x18] sm:$0xff] }
  0x43   :  { %401 = vmatpush1.bf16.msra.mxu0 %v400_v5  ;;  %459 = vmatprep.subr.bf16.mxu1 %v458_v19  ;;  %v120_v56 = vld [vmem:[#allocation5 + $0x248] sm:$0xff]  ;;  %v43_v58 = vld [vmem:[#allocation2] sm:$0xff]  ;;  %v420_v59 = vpack.c.bf16 %v116_v55, %v113_v54  ;;  %v122_v63 = vld [vmem:[#allocation5 + $0x258] sm:$0xff] }
  0x44   :  { %403 = vmatprep.subr.bf16.mxu0 %v402_v10  ;;  %v422_v61 = vpack.c.bf16 %v123_v57, %v120_v56  ;;  %v119_v62 = vld [vmem:[#allocation5 + $0x240] sm:$0xff]  ;;  %v126_v0 = vld [vmem:[#allocation5 + $0x278] sm:$0xff]  ;;  %v129_v1 = vld [vmem:[#allocation5 + $0x290] sm:$0xff] }
  0x45   :  { %v45_v2 = vld [vmem:[#allocation2 + $0x10] sm:$0xff]  ;;  %v424_v3 = vpack.c.bf16 %v122_v63, %v119_v62  ;;  %v426_v4 = vpack.c.bf16 %v129_v1, %v126_v0  ;;  %v128_v6 = vld [vmem:[#allocation5 + $0x288] sm:$0xff]  ;;  %v135_v8 = vld [vmem:[#allocation5 + $0x2c0] sm:$0xff] }
  0x46   :  { %461 = vmatpush3.bf16.msra.mxu1 %v460_v28  ;;  %v125_v5 = vld [vmem:[#allocation5 + $0x270] sm:$0xff]  ;;  %v132_v7 = vld [vmem:[#allocation5 + $0x2a8] sm:$0xff]  ;;  %v131_v11 = vld [vmem:[#allocation5 + $0x2a0] sm:$0xff] }
  0x47   :  { %405 = vmatpush1.bf16.msra.mxu0 %v404_v17  ;;  %463 = vmatprep.subr.bf16.mxu1 %v462_v32  ;;  %v428_v9 = vpack.c.bf16 %v128_v6, %v125_v5  ;;  %v430_v10 = vpack.c.bf16 %v135_v8, %v132_v7  ;;  %v134_v12 = vld [vmem:[#allocation5 + $0x2b8] sm:$0xff]  ;;  %v141_v14 = vld [vmem:[#allocation5 + $0x2f0] sm:$0xff]  ;;  %v140_v18 = vld [vmem:[#allocation5 + $0x2e8] sm:$0xff] }
  0x48   :  { %407 = vmatprep.subr.bf16.mxu0 %v406_v22  ;;  %v138_v13 = vld [vmem:[#allocation5 + $0x2d8] sm:$0xff]  ;;  %v432_v15 = vpack.c.bf16 %v134_v12, %v131_v11  ;;  %v137_v17 = vld [vmem:[#allocation5 + $0x2d0] sm:$0xff]  ;;  %v155_v22 = vsub.s32 2, %v146_v21  ;;  %v143_v23 = vld [vmem:[%s623_s2] sm:$0x7]  ;;  %s555_s2 = smov [#allocation7]  }
  0x49   :  { %v434_v16 = vpack.c.bf16 %v141_v14, %v138_v13  ;;  %v436_v19 = vpack.c.bf16 %v140_v18, %v137_v17  ;;  %v152_v36 = vrot.slane %v143_v23, %v151_v34  ;;  %s323_s13 = sshll.u32 %s555_s2, 4  ;;  %s324_s13 = int_to_ptr.vmem [resolvable:$true] %s323_s13 }
  0x4a   :  { %465 = vmatpush3.bf16.msra.mxu1 %v464_v41  ;;  %v156_v25 = vrot.slane %v143_v23, %v155_v22  ;;  %s521_s14 = scalar_lea.vmem %s324_s13, 768  ;;  %p526_p3 = scmp.lt.s32.totalorder %s324_s13, %s324_s13 }
  0x4b   :  { %409 = vmatpush1.bf16.msra.mxu0 %v408_v30  ;;  %467 = vmatprep.subr.bf16.mxu1 %v466_v43  ;;  %p522_p2 = scmp.ne.s32.totalorder %s324_s13, %s521_s14  ;;  %p527_p4 = scmp.lt.s32.totalorder %s521_s14, %s521_s14 }
  0x4c   :  { %411 = vmatprep.subr.bf16.mxu0 %v410_v35  ;;  %v148_v35 = vrot.slane %v143_v23, %v147_v33 }
  0x4d   :  { %p528_p5 = por %p527_p4, %p526_p3 }
  0x4e   :  { %469 = vmatpush3.bf16.msra.mxu1 %v468_v51 }
  0x4f   :  { %413 = vmatpush1.bf16.msra.mxu0 %v412_v42  ;;  %p529_p6 = pnand %p528_p5, %p522_p2 }
  0x50   :  { %415 = vmatprep.subr.bf16.mxu0 %v414_v46 }
  0x51   :  { %302 = vmatmul.mubr.f32.vlgmr.msra.gmra.mrb[0].mxu1 %v43_v58 }
  0x52   :  { %306 = vmatprep.mubr.f32.mxu1 %v46_v60 }
  0x53   :  { %417 = vmatpush1.bf16.msra.mxu0 %v416_v52 }
  0x54   :  { %419 = vmatprep.subr.bf16.mxu0 %v418_v53 }
  0x55   :  { %307 = vmatmul.mubr.f32.gmra.mrb[2].mxu1 %v45_v2 }
  0x57   :  { %421 = vmatpush1.bf16.msra.mxu0 %v420_v59 }
  0x58   :  { %423 = vmatprep.subr.bf16.mxu0 %v422_v61 }
  0x5b   :  { %425 = vmatpush1.bf16.msra.mxu0 %v424_v3 }
  0x5c   :  { %427 = vmatprep.subr.bf16.mxu0 %v426_v4 }
  0x5f   :  { %429 = vmatpush1.bf16.msra.mxu0 %v428_v9 }
  0x60   :  { %431 = vmatprep.subr.bf16.mxu0 %v430_v10 }
  0x63   :  { %433 = vmatpush1.bf16.msra.mxu0 %v432_v15 }
  0x64   :  { %435 = vmatprep.subr.bf16.mxu0 %v434_v16 }
  0x67   :  { %437 = vmatpush1.bf16.msra.mxu0 %v436_v19 }
  0x6a   :  { %225 = vmatmul.mubr.f32.vlgmr.msra.gmra.mrb[0].mxu0 %v43_v58 }
  0x6b   :  { %230 = vmatprep.mubr.f32.mxu0 %v46_v60 }
  0x6e   :  { %231 = vmatmul.mubr.f32.gmra.mrb[2].mxu0 %v45_v2 }
 0x124   :  { %v368_v24 = vpop.f32.mrb[0].mxu1 }
 0x125   :  { %v369_v26 = vpop.f32.mrb[1].mxu1 }
 0x126   :  { %v370_v27 = vadd.f32 %v369_v26, %v368_v24 }
 0x128   :  { %v304_v28 = vadd.f32 %v370_v27, %v156_v25  ;;  %v371_v29 = vpop.f32.mrb[2].mxu1 }
 0x129   :  { %v372_v30 = vpop.f32.mrb[3].mxu1 }
 0x12a   :  { %314 = vst [vmem:[#allocation7 + $0x10] sm:$0xff] %v304_v28  ;;  %v373_v31 = vadd.f32 %v372_v30, %v371_v29 }
 0x12c   :  { %v309_v32 = vadd.f32 %v373_v31, %v156_v25 }
 0x12e   :  { %317 = vst [vmem:[#allocation7 + $0x28] sm:$0xff] %v309_v32 }
 0x13d   :  { %v226_v37 = vpop.f32.mrb[0].mxu0 }
 0x13e   :  { %v227_v38 = vadd.f32 %v226_v37, %v148_v35  ;;  %v228_v39 = vpop.f32.mrb[1].mxu0 }
 0x13f   :  { %v229_v40 = vadd.f32 %v228_v39, %v152_v36 }
 0x140   :  { %312 = vst [vmem:[#allocation7] sm:$0xff] %v227_v38 }
 0x141   :  { %313 = vst [vmem:[#allocation7 + $0x8] sm:$0xff] %v229_v40  ;;  %v232_v41 = vpop.f32.mrb[2].mxu0 }
 0x142   :  { %v233_v42 = vadd.f32 %v232_v41, %v148_v35  ;;  %v234_v43 = vpop.f32.mrb[3].mxu0 }
 0x143   :  { %v235_v44 = vadd.f32 %v234_v43, %v152_v36 }
 0x144   :  { %315 = vst [vmem:[#allocation7 + $0x18] sm:$0xff] %v233_v42 }
 0x145   :  { %316 = vst [vmem:[#allocation7 + $0x20] sm:$0xff] %v235_v44 }
 0x146   :  { %532 = shalt.err (!%p529_p6)
}
 0x147   :  { %s533_s17 = scalar_lea.hbm %s624_s3, 768 }
 0x148   :  { %p534_p7 = scmp.ne.s32.totalorder %s624_s3, %s533_s17  ;;  %p537_p8 = scmp.lt.u32.totalorder %s533_s17, %s624_s3 }
 0x14a   :  { %p539_p9 = pnand %p537_p8, %p534_p7 }
 0x14c   :  { %542 = shalt.err (!%p539_p9)
}
 0x14d   :  { %329 = dma.vmem_to_hbm [thread:$0]  %s324_s13, 768, %s624_s3, [#allocation4], %s553_s0, %s553_s0, %s554_s9  }
 0x14e   :  { %547 = dma.done.wait [#allocation4], 768  }
 0x14f   :  { %548 = vsyncadd [#allocation4], 4294966528 }
 0x150   :  { %333 = vsyncpa [#allocation3], 1 }
 0x151   :  { %334 = vsyncpa [#allocation6], 1 }
 0x152   :  { %335 = vsyncpa [#allocation4], 1 }

</bundles_post_ra>
